<compile_context>
chip_gen: v6e
topology: v6e:2x2x1
jax: 0.10.0
libtpu: 0.0.40
codegen_flags: <defaults>
</compile_context>

<pallas_src>
import functools
import math

import jax
import jax.numpy as jnp
from jax.experimental import pallas as pl
from jax.experimental.pallas import tpu as pltpu

_LANES = 128       # vreg lane width -> lane-dense layer widths
_SUBLANES = 8


def _round_up(x: int, m: int) -> int:
    return -(-x // m) * m


def _fused_mlp_kernel(x_ref, w_ref, b_ref, o_ref, *,
                      row_offsets, in_rows, out_features):
    """Single-invocation fused MLP.

    x_ref : (B, F0)                  f32  activations
    w_ref : (sum_i in_rows_i, Wmax)  bf16 all layer weights, pre-transposed to (in, out),
                                          zero-padded to lane-dense widths, row-concatenated
    b_ref : (L, 1, Wmax)             f32  biases, zero-padded to Wmax
    o_ref : (B, out_features)        f32

    Padded weight columns / bias lanes are exactly zero, so padded activation lanes
    carry tanh(0)=0 and never perturb the real outputs.
    """
    n_layers = len(row_offsets)
    h = x_ref[...]                                        # f32
    for i in range(n_layers):                             # unrolled at trace time
        off = row_offsets[i]
        w = w_ref[off:off + in_rows[i], :]                # static slice -> (in_i, Wmax) bf16
        # bf16 x bf16 on the MXU, f32 accumulation; bias add / tanh stay in f32.
        h = jnp.dot(h.astype(jnp.bfloat16), w,
                    preferred_element_type=jnp.float32)
        h = h + b_ref[i]                                  # (1, Wmax) broadcast over batch
        if i != n_layers - 1:                             # hidden layers: Tanh (EUP)
            h = jnp.tanh(h)
    # Only the true output columns are stored (one tiny masked store; avoids an
    # extra wrapper-side slice op after the custom call).
    o_ref[...] = h[:, :out_features].astype(o_ref.dtype)


@functools.partial(
    jax.jit,
    static_argnames=("flatten", "row_offsets", "in_rows", "out_features"))
def mlp_forward(x, w_cat, b_cat, *, flatten, row_offsets, in_rows, out_features):
    """Fused forward for the whole MLP in one grid-less pallas_call.

    Three operands total (x, packed weights, packed biases); everything is
    whole-array resident in VMEM (~300 KB here), no grid, no batch padding.
    """
    if flatten:
        x = x.reshape(x.shape[0], -1)
    batch = x.shape[0]

    kernel = functools.partial(
        _fused_mlp_kernel,
        row_offsets=row_offsets, in_rows=in_rows, out_features=out_features)

    # TODO(synk): for large batches, switch to a batch-tiled grid (block ~128-256 rows
    # on x/out, weights whole-resident via index_map lambda i: (0, 0)) so BlockSpec
    # double-buffering overlaps activation DMA with MXU compute, and mark the batch
    # axis "parallel" so v7x's two TensorCores both get work. Not worth +0.35us/step
    # at batch=2.
    # TODO(synk): if layer widths grow, re-derive the whole-residency threshold against
    # v7x's 64 MiB VMEM (32 MiB scoped default) / v5e's 16 MiB scoped default, raise
    # pltpu.CompilerParams(vmem_limit_bytes=...), or K-tile the big matmul.
    return pl.pallas_call(
        kernel,
        out_shape=jax.ShapeDtypeStruct((batch, out_features), jnp.float32),
        in_specs=[pl.BlockSpec(memory_space=pltpu.VMEM)] * 3,
        out_specs=pl.BlockSpec(memory_space=pltpu.VMEM),
    )(x, w_cat, b_cat)


class FullyConnectedX:
    """JAX/Pallas port of the PyTorch FullyConnectedX module.

    sizes: list of layer widths. Hidden layers use Tanh (the default activation_fn);
    the final Linear has no activation (last_fn=None, dropout=False -- spec defaults).
    """

    def __init__(self, sizes, key, flatten=False):
        # TODO(synk): dropout / last_fn branches (disabled by default in the spec)
        # are not implemented.
        self.flatten = flatten
        self.sizes = list(sizes)
        self.out_features = int(sizes[-1])
        n_layers = len(sizes) - 1

        # One uniform lane-dense column width for every layer.
        # TODO(synk): for very wide MLPs with a narrow final layer, use per-layer
        # column widths instead of a single Wmax to avoid padding the last block.
        w_max = max(_round_up(int(s), _LANES) for s in sizes[1:])

        blocks, bias_rows, row_offsets, in_rows = [], [], [], []
        self.params_f32 = []     # (in, out) f32 weights + (1, out) biases, reference only
        offset = 0
        for i in range(n_layers):
            fan_in, fan_out = int(sizes[i]), int(sizes[i + 1])
            key, kw, kb = jax.random.split(key, 3)
            bound = 1.0 / math.sqrt(fan_in)          # nn.Linear default init range
            w = jax.random.uniform(kw, (fan_out, fan_in), jnp.float32, -bound, bound)
            b = jax.random.uniform(kb, (fan_out,), jnp.float32, -bound, bound)
            self.params_f32.append((w.T, b.reshape(1, fan_out)))

            # Rows of this block = features the layer consumes inside the kernel:
            # the raw input width for layer 0 (1024 here, sublane-aligned), the
            # lane-padded hidden width for all later layers.
            rows = fan_in if i == 0 else w_max
            blk = jnp.zeros((rows, w_max), jnp.float32)
            blk = blk.at[:fan_in, :fan_out].set(w.T)       # pre-transposed (in, out)
            blocks.append(blk.astype(jnp.bfloat16))        # bf16 storage; f32 accumulate in-kernel

            brow = jnp.zeros((1, w_max), jnp.float32)
            bias_rows.append(brow.at[0, :fan_out].set(b))

            row_offsets.append(offset)
            in_rows.append(rows)
            offset += rows

        self.w_cat = jnp.concatenate(blocks, axis=0)       # (sum rows, w_max) bf16 -- one operand
        self.b_cat = jnp.stack(bias_rows, axis=0)          # (L, 1, w_max)    f32  -- one operand
        self.row_offsets = tuple(row_offsets)
        self.in_rows = tuple(in_rows)

    def __call__(self, x):
        return mlp_forward(
            x, self.w_cat, self.b_cat,
            flatten=self.flatten,
            row_offsets=self.row_offsets,
            in_rows=self.in_rows,
            out_features=self.out_features)


def reference_forward_matched(model, x):
    """Pure-JAX reference with the same numerics as the kernel
    (bf16 matmul inputs, f32 accumulation, f32 bias/tanh)."""
    if model.flatten:
        x = x.reshape(x.shape[0], -1)
    h = x
    n_layers = len(model.row_offsets)
    for i in range(n_layers):
        off, rows = model.row_offsets[i], model.in_rows[i]
        w = model.w_cat[off:off + rows, :]
        h = jnp.dot(h.astype(jnp.bfloat16), w, preferred_element_type=jnp.float32)
        h = h + model.b_cat[i]
        if i != n_layers - 1:
            h = jnp.tanh(h)
    return h[:, :model.out_features]


def reference_forward_f32(model, x):
    """Full-f32 reference matching the PyTorch module exactly (looser tolerance,
    since the kernel uses bf16 matmul inputs with f32 accumulation)."""
    if model.flatten:
        x = x.reshape(x.shape[0], -1)
    n_layers = len(model.params_f32)
    for i, (w_t, b2) in enumerate(model.params_f32):
        x = x @ w_t + b2
        if i != n_layers - 1:
            x = jnp.tanh(x)
    return x


if __name__ == "__main__":
    key = jax.random.PRNGKey(0)
    k_in, k_params = jax.random.split(key)

    # NCHW input; flatten=True -> (B, C*H*W) = (2, 1024), then MLP 1024 -> 32 -> 16.
    B, C, H, W = 2, 4, 16, 16
    x = jax.random.normal(k_in, (B, C, H, W), dtype=jnp.float32)

    sizes = [C * H * W, 32, 16]
    model = FullyConnectedX(sizes, key=k_params, flatten=True)

    out = jax.block_until_ready(model(x))
    assert out.shape == (B, sizes[-1])

    # Precision-matched reference (same bf16/f32 mixed math): tight check.
    ref_matched = reference_forward_matched(model, x)
    assert jnp.allclose(out, ref_matched, atol=1e-4, rtol=1e-4)

    # Full-f32 reference (PyTorch semantics): loose check for the bf16 weights.
    ref_f32 = reference_forward_f32(model, x)
    assert jnp.allclose(out, ref_f32, atol=5e-2, rtol=5e-2)

    print("KERNEL_OK")
</pallas_src>

<mosaic_0001>
module attributes {stable_mosaic.version = 11 : i64} {
  func.func @_fused_mlp_kernel(%arg0: memref<2x1024xf32, #tpu.memory_space<vmem>>, %arg1: memref<1152x128xbf16, #tpu.memory_space<vmem>>, %arg2: memref<2x1x128xf32, #tpu.memory_space<vmem>>, %arg3: memref<2x16xf32, #tpu.memory_space<vmem>>) attributes {dimension_semantics = [], scalar_prefetch = 0 : i64, scratch_operands = 0 : i64, tpu.core_type = #tpu.core_type<tc>} {
    %c0 = arith.constant 0 : index
    %c0_0 = arith.constant 0 : index
    %0 = vector.load %arg0[%c0, %c0_0] : memref<2x1024xf32, #tpu.memory_space<vmem>>, vector<2x1024xf32>
    %c0_1 = arith.constant 0 : index
    %c0_2 = arith.constant 0 : index
    %1 = vector.load %arg1[%c0_1, %c0_2] : memref<1152x128xbf16, #tpu.memory_space<vmem>>, vector<1024x128xbf16>
    %2 = arith.truncf %0 : vector<2x1024xf32> to vector<2x1024xbf16>
    %cst = arith.constant dense<0.000000e+00> : vector<2x128xf32>
    %3 = tpu.matmul %2, %1, %cst {dimension_numbers = #tpu.dot_dimension_numbers<[1], [0], [0], [1], [0, 0, 1, 1], [], []>} : vector<2x1024xbf16>, vector<1024x128xbf16>, vector<2x128xf32> -> vector<2x128xf32>
    %c0_3 = arith.constant 0 : index
    %c0_4 = arith.constant 0 : index
    %c0_5 = arith.constant 0 : index
    %4 = vector.load %arg2[%c0_3, %c0_4, %c0_5] : memref<2x1x128xf32, #tpu.memory_space<vmem>>, vector<1x1x128xf32>
    %5 = vector.shape_cast %4 : vector<1x1x128xf32> to vector<1x128xf32>
    %6 = vector.broadcast %5 : vector<1x128xf32> to vector<2x128xf32>
    %7 = arith.addf %3, %6 : vector<2x128xf32>
    %8 = math.tanh %7 : vector<2x128xf32>
    %c1024 = arith.constant 1024 : index
    %c0_6 = arith.constant 0 : index
    %9 = vector.load %arg1[%c1024, %c0_6] : memref<1152x128xbf16, #tpu.memory_space<vmem>>, vector<128x128xbf16>
    %10 = arith.truncf %8 : vector<2x128xf32> to vector<2x128xbf16>
    %cst_7 = arith.constant dense<0.000000e+00> : vector<2x128xf32>
    %11 = tpu.matmul %10, %9, %cst_7 {dimension_numbers = #tpu.dot_dimension_numbers<[1], [0], [0], [1], [0, 0, 1, 1], [], []>} : vector<2x128xbf16>, vector<128x128xbf16>, vector<2x128xf32> -> vector<2x128xf32>
    %c1 = arith.constant 1 : index
    %c0_8 = arith.constant 0 : index
    %c0_9 = arith.constant 0 : index
    %12 = vector.load %arg2[%c1, %c0_8, %c0_9] : memref<2x1x128xf32, #tpu.memory_space<vmem>>, vector<1x1x128xf32>
    %13 = vector.shape_cast %12 : vector<1x1x128xf32> to vector<1x128xf32>
    %14 = vector.broadcast %13 : vector<1x128xf32> to vector<2x128xf32>
    %15 = arith.addf %11, %14 : vector<2x128xf32>
    %16 = vector.extract_strided_slice %15 {offsets = [0, 0], sizes = [2, 16], strides = [1, 1]} : vector<2x128xf32> to vector<2x16xf32>
    %c0_10 = arith.constant 0 : index
    %c0_11 = arith.constant 0 : index
    %17 = vector.load %arg3[%c0_10, %c0_11] : memref<2x16xf32, #tpu.memory_space<vmem>>, vector<2x16xf32>
    tpu.vector_store %arg3[%c0_10, %c0_11], %16 {strides = array<i32>} : memref<2x16xf32, #tpu.memory_space<vmem>>, vector<2x16xf32>,
    return
  }
}

</mosaic_0001>

<bundles_post_ra>
// kernel: mlp_forward.1
= control target key start
LH: loop header
LB: loop body
LE: loop exit
PB: predicated region body
PF: predicated region fallthrough
CT: control target
= control target key end

     0   :  { %8 = vsyncpa [#allocation3], 0  ;;  %s1264_s0 = inlined_call_operand.vmem [shape: f32[2,1024], index: 0, kind: input, shape index: {}]   ;;  %s1265_s1 = inlined_call_operand.hbm [shape: bf16[1152,128], index: 1, kind: input, shape index: {}]   ;;  %s1266_s2 = inlined_call_operand.vmem [shape: f32[2,1,128], index: 2, kind: input, shape index: {}]   ;;  %s1267_s3 = inlined_call_operand.hbm [shape: f32[2,16], index: 3, kind: output, shape index: {}]  }
   0x1   :  { %9 = vsyncpa [#allocation4], 0  ;;  %s1213_s12 = smov [#allocation2]  }
   0x2   :  { %s17_s13 = sshll.u32 %s1213_s12, 4  ;;  %s18_s13 = int_to_ptr.vmem [resolvable:$true] %s17_s13 }
   0x3   :  { %s1177_s14 = scalar_lea.vmem %s18_s13, 9216  ;;  %p1182_p1 = scmp.lt.s32.totalorder %s18_s13, %s18_s13 }
   0x4   :  { %p1178_p0 = scmp.ne.s32.totalorder %s18_s13, %s1177_s14  ;;  %p1183_p2 = scmp.lt.s32.totalorder %s1177_s14, %s1177_s14 }
   0x6   :  { %p1184_p3 = por %p1183_p2, %p1182_p1 }
   0x8   :  { %p1185_p4 = pnand %p1184_p3, %p1178_p0 }
   0xa   :  { %1188 = shalt.err (!%p1185_p4)
}
   0xb   :  { %s1214_s15 = smov 64   ;;  %s1215_s16 = smov 4  }
   0xc   :  { %23 = dma.hbm_to_vmem [thread:$0]  %s1265_s1, 9216, %s18_s13, [#allocation3], %s1214_s15, %s1214_s15, %s1215_s16  }
   0xd   :  { %1209 = dma.done.wait [#allocation3], 9216  }
   0xe   :  { %1210 = vsyncadd [#allocation3], 4294958080  ;;  %v1093_v0 = vld [vmem:[#allocation2 + $0x78] sm:$0xff]   ;;  %v1097_v4 = vld [vmem:[#allocation2 + $0x70] sm:$0xff]   ;;  %v1216_v22 = vmov 1983009808   ;;  %v166_v24 = vlaneseq }
   0xf   :  { %v1094_v1 = vld [vmem:[#allocation2 + $0xf8] sm:$0xff]   ;;  %969 = vmatprep.subr.bf16.mxu0 %v1093_v0  ;;  %v1098_v5 = vld [vmem:[#allocation2 + $0xf0] sm:$0xff]   ;;  %v1101_v8 = vld [vmem:[#allocation2 + $0x68] sm:$0xff]   ;;  %v164_v23 = vunpack.c.l.s4 %v1216_v22  ;;  %vm1218_vm0 = vmmov 0   ;;  %s1219_s25 = smov [#allocation5]   ;;  %vm877_vm1 = vcmask 123904  }
  0x10   :  { %v1095_v2 = vld [vmem:[#allocation2 + $0x38] sm:$0xff]   ;;  %991 = vmatprep.subr.bf16.mxu1 %v1094_v1  ;;  %v1099_v6 = vld [vmem:[#allocation2 + $0x30] sm:$0xff]   ;;  %v1102_v9 = vld [vmem:[#allocation2 + $0xe8] sm:$0xff]   ;;  %v167_v30 = vshrl.u32 %v166_v24, 7  ;;  %s885_s26 = sshll.u32 %s1219_s25, 4  ;;  %s886_s26 = int_to_ptr.vmem [resolvable:$true] %s885_s26 }
  0x11   :  { %v1096_v3 = vld [vmem:[#allocation2 + $0xb8] sm:$0xff]   ;;  %970 = vmatpush3.bf16.msra.mxu0 %v1095_v2  ;;  %v1100_v7 = vld [vmem:[#allocation2 + $0xb0] sm:$0xff]   ;;  %v1103_v10 = vld [vmem:[#allocation2 + $0x28] sm:$0xff]   ;;  %v165_v29 = vunpack.c.0.s8 %v164_v23  ;;  %s1189_s27 = scalar_lea.vmem %s886_s26, 32  ;;  %p1194_p6 = scmp.lt.s32.totalorder %s886_s26, %s886_s26 }
  0x12   :  { %992 = vmatpush3.bf16.msra.mxu1 %v1096_v3  ;;  %971 = vmatprep.subr.bf16.mxu0 %v1097_v4  ;;  %v1104_v11 = vld [vmem:[#allocation2 + $0xa8] sm:$0xff]   ;;  %v1105_v12 = vld [vmem:[#allocation2 + $0x60] sm:$0xff]   ;;  %v1109_v16 = vld [vmem:[#allocation2 + $0x58] sm:$0xff]   ;;  %p1190_p5 = scmp.ne.s32.totalorder %s886_s26, %s1189_s27  ;;  %p1195_p7 = scmp.lt.s32.totalorder %s1189_s27, %s1189_s27 }
  0x13   :  { %993 = vmatprep.subr.bf16.mxu1 %v1098_v5  ;;  %v1106_v13 = vld [vmem:[#allocation2 + $0xe0] sm:$0xff]   ;;  %v1110_v17 = vld [vmem:[#allocation2 + $0xd8] sm:$0xff]   ;;  %v1113_v20 = vld [vmem:[#allocation2 + $0x50] sm:$0xff]   ;;  %v1243_v35 = vsub.s32 %v165_v29, %v167_v30 }
  0x14   :  { %v1107_v14 = vld [vmem:[#allocation2 + $0x20] sm:$0xff]   ;;  %v1111_v18 = vld [vmem:[#allocation2 + $0x18] sm:$0xff]   ;;  %v1114_v21 = vld [vmem:[#allocation2 + $0xd0] sm:$0xff]   ;;  %p1196_p8 = por %p1195_p7, %p1194_p6 }
  0x15   :  { %972 = vmatpush3.bf16.msra.mxu0 %v1099_v6  ;;  %v1108_v15 = vld [vmem:[#allocation2 + $0xa0] sm:$0xff]   ;;  %v1112_v19 = vld [vmem:[#allocation2 + $0x98] sm:$0xff]   ;;  %v1115_v25 = vld [vmem:[#allocation2 + $0x10] sm:$0xff]  }
  0x16   :  { %994 = vmatpush3.bf16.msra.mxu1 %v1100_v7  ;;  %973 = vmatprep.subr.bf16.mxu0 %v1101_v8  ;;  %v1116_v26 = vld [vmem:[#allocation2 + $0x90] sm:$0xff]   ;;  %v1117_v27 = vld [vmem:[#allocation2 + $0x48] sm:$0xff]   ;;  %v1121_v33 = vld [vmem:[#allocation2 + $0x40] sm:$0xff]   ;;  %p1197_p9 = pnand %p1196_p8, %p1190_p5 }
  0x17   :  { %995 = vmatprep.subr.bf16.mxu1 %v1102_v9  ;;  %v1118_v28 = vld [vmem:[#allocation2 + $0xc8] sm:$0xff]   ;;  %v1122_v34 = vld [vmem:[#allocation2 + $0xc0] sm:$0xff]   ;;  %v1126_v41 = vld [vmem:[#allocation2 + $0x178] sm:$0xff]  }
  0x18   :  { %v1119_v31 = vld [vmem:[#allocation2 + $0x8] sm:$0xff]   ;;  %v1123_v36 = vld [vmem:[#allocation2] sm:$0xff]   ;;  %v1127_v42 = vld [vmem:[#allocation2 + $0x1f8] sm:$0xff]  }
  0x19   :  { %974 = vmatpush3.bf16.msra.mxu0 %v1103_v10  ;;  %v1120_v32 = vld [vmem:[#allocation2 + $0x88] sm:$0xff]   ;;  %v1124_v37 = vld [vmem:[#allocation2 + $0x80] sm:$0xff]   ;;  %v1128_v46 = vld [vmem:[#allocation2 + $0x138] sm:$0xff]  }
  0x1a   :  { %996 = vmatpush3.bf16.msra.mxu1 %v1104_v11  ;;  %975 = vmatprep.subr.bf16.mxu0 %v1105_v12  ;;  %v30_v38 = vld [vmem:[%s1264_s0] sm:$0xff]  ;;  %v1129_v49 = vld [vmem:[#allocation2 + $0x1b8] sm:$0xff]   ;;  %v1130_v51 = vld [vmem:[#allocation2 + $0x170] sm:$0xff]  }
  0x1b   :  { %997 = vmatprep.subr.bf16.mxu1 %v1106_v13  ;;  %v169_v39 = vrot.slane %v30_v38, %v1243_v35  ;;  %v162_v40 = vcombine.high %v30_v38, %v30_v38  ;;  %v1131_v53 = vld [vmem:[#allocation2 + $0x1f0] sm:$0xff]   ;;  %v1134_v56 = vld [vmem:[#allocation2 + $0x168] sm:$0xff]   ;;  %v1138_v60 = vld [vmem:[#allocation2 + $0x160] sm:$0xff]  }
  0x1c   :  { %v1132_v54 = vld [vmem:[#allocation2 + $0x130] sm:$0xff]   ;;  %v1135_v57 = vld [vmem:[#allocation2 + $0x1e8] sm:$0xff]   ;;  %v1139_v61 = vld [vmem:[#allocation2 + $0x1e0] sm:$0xff]  }
  0x1d   :  { %976 = vmatpush3.bf16.msra.mxu0 %v1107_v14  ;;  %v177_v43 = vcombine.high %v169_v39, %v169_v39  ;;  %v176_v44 = vrot.slane %v162_v40, %v1243_v35  ;;  %v204_v45 = vpack.c.bf16 %v169_v39, %v169_v39  ;;  %v1133_v55 = vld [vmem:[#allocation2 + $0x1b0] sm:$0xff]   ;;  %v1136_v58 = vld [vmem:[#allocation2 + $0x128] sm:$0xff]   ;;  %v1140_v62 = vld [vmem:[#allocation2 + $0x120] sm:$0xff]  }
  0x1e   :  { %998 = vmatpush3.bf16.msra.mxu1 %v1108_v15  ;;  %977 = vmatprep.subr.bf16.mxu0 %v1109_v16  ;;  %v1137_v59 = vld [vmem:[#allocation2 + $0x1a8] sm:$0xff]   ;;  %v1141_v63 = vld [vmem:[#allocation2 + $0x1a0] sm:$0xff]   ;;  %v1142_v0 = vld [vmem:[#allocation2 + $0x158] sm:$0xff]  }
  0x1f   :  { %999 = vmatprep.subr.bf16.mxu1 %v1110_v17  ;;  %v205_v47 = vpack.c.bf16 %v177_v43, %v177_v43  ;;  %v178_v48 = vcombine.high %v176_v44, %v176_v44  ;;  %v206_v50 = vpack.c.bf16 %v176_v44, %v176_v44  ;;  %v1143_v1 = vld [vmem:[#allocation2 + $0x1d8] sm:$0xff]   ;;  %v1146_v4 = vld [vmem:[#allocation2 + $0x150] sm:$0xff]   ;;  %v1150_v8 = vld [vmem:[#allocation2 + $0x148] sm:$0xff]  }
  0x20   :  { %v1144_v2 = vld [vmem:[#allocation2 + $0x118] sm:$0xff]   ;;  %v1147_v5 = vld [vmem:[#allocation2 + $0x1d0] sm:$0xff]   ;;  %v1151_v9 = vld [vmem:[#allocation2 + $0x1c8] sm:$0xff]  }
  0x21   :  { %978 = vmatpush3.bf16.msra.mxu0 %v1111_v18  ;;  %635 = vmatprep.mubr.bf16.mxu0 %v205_v47  ;;  %v207_v52 = vpack.c.bf16 %v178_v48, %v178_v48  ;;  %v1145_v3 = vld [vmem:[#allocation2 + $0x198] sm:$0xff]   ;;  %v1148_v6 = vld [vmem:[#allocation2 + $0x110] sm:$0xff]   ;;  %v1152_v10 = vld [vmem:[#allocation2 + $0x108] sm:$0xff]  }
  0x22   :  { %1000 = vmatpush3.bf16.msra.mxu1 %v1112_v19  ;;  %979 = vmatprep.subr.bf16.mxu0 %v1113_v20  ;;  %v1149_v7 = vld [vmem:[#allocation2 + $0x190] sm:$0xff]   ;;  %v1153_v11 = vld [vmem:[#allocation2 + $0x188] sm:$0xff]   ;;  %v1154_v12 = vld [vmem:[#allocation2 + $0x140] sm:$0xff]  }
  0x23   :  { %1001 = vmatprep.subr.bf16.mxu1 %v1114_v21  ;;  %675 = vmatprep.mubr.bf16.mxu1 %v207_v52  ;;  %v1155_v13 = vld [vmem:[#allocation2 + $0x1c0] sm:$0xff]   ;;  %v31_v15 = vld [vmem:[%s1264_s0 + $0x8] sm:$0xff] }
  0x24   :  { %v1156_v14 = vld [vmem:[#allocation2 + $0x100] sm:$0xff]   ;;  %v186_v17 = vrot.slane %v31_v15, %v1243_v35  ;;  %v179_v18 = vcombine.high %v31_v15, %v31_v15  ;;  %v1161_v29 = vld [vmem:[#allocation2 + $0x228] sm:$0xff]  }
  0x25   :  { %980 = vmatpush3.bf16.msra.mxu0 %v1115_v25  ;;  %v1157_v16 = vld [vmem:[#allocation2 + $0x180] sm:$0xff]  }
  0x26   :  { %1002 = vmatpush3.bf16.msra.mxu1 %v1116_v26  ;;  %981 = vmatprep.subr.bf16.mxu0 %v1117_v27  ;;  %v194_v19 = vcombine.high %v186_v17, %v186_v17  ;;  %v193_v20 = vrot.slane %v179_v18, %v1243_v35  ;;  %v208_v21 = vpack.c.bf16 %v186_v17, %v186_v17  ;;  %v1159_v26 = vld [vmem:[#allocation2 + $0x238] sm:$0xff]   ;;  %v1217_v27 = vmov 0.0   ;;  %v1162_v30 = vld [vmem:[#allocation2 + $0x220] sm:$0xff]  }
  0x27   :  { %1003 = vmatprep.subr.bf16.mxu1 %v1118_v28  ;;  %v1160_v28 = vld [vmem:[#allocation2 + $0x230] sm:$0xff]   ;;  %v894_v44 = vld [vmem:[%s1266_s2] ss:$0 sm:$0xff] }
  0x28   :  { %v209_v22 = vpack.c.bf16 %v194_v19, %v194_v19  ;;  %v195_v23 = vcombine.high %v193_v20, %v193_v20  ;;  %v210_v24 = vpack.c.bf16 %v193_v20, %v193_v20 }
  0x29   :  { %982 = vmatpush3.bf16.msra.mxu0 %v1119_v31  ;;  %v1163_v31 = vld [vmem:[#allocation2 + $0x218] sm:$0xff]  }
  0x2a   :  { %1004 = vmatpush3.bf16.msra.mxu1 %v1120_v32  ;;  %983 = vmatprep.subr.bf16.mxu0 %v1121_v33  ;;  %v211_v25 = vpack.c.bf16 %v195_v23, %v195_v23  ;;  %v1164_v32 = vld [vmem:[#allocation2 + $0x210] sm:$0xff]   ;;  %v1165_v33 = vld [vmem:[#allocation2 + $0x208] sm:$0xff]  }
  0x2b   :  { %1005 = vmatprep.subr.bf16.mxu1 %v1122_v34  ;;  %v1166_v34 = vld [vmem:[#allocation2 + $0x200] sm:$0xff]  }
  0x2d   :  { %984 = vmatpush3.bf16.msra.mxu0 %v1123_v36 }
  0x2e   :  { %1006 = vmatpush3.bf16.msra.mxu1 %v1124_v37  ;;  %1013 = vmatprep.subr.bf16.mxu0 %v1126_v41 }
  0x2f   :  { %1035 = vmatprep.subr.bf16.mxu1 %v1127_v42 }
  0x30   :  { %636 = vmatmul.mubr.bf16.vlgmr.msra.gmra.mxu0 %v204_v45 }
  0x31   :  { %1014 = vmatpush3.bf16.msra.mxu0 %v1128_v46  ;;  %676 = vmatmul.mubr.bf16.vlgmr.msra.gmra.mxu1 %v206_v50 }
  0x32   :  { %1015 = vmatprep.subr.bf16.mxu0 %v1130_v51  ;;  %1036 = vmatpush3.bf16.msra.mxu1 %v1129_v49 }
  0x33   :  { %1037 = vmatprep.subr.bf16.mxu1 %v1131_v53  ;;  %715 = vmatprep.mubr.bf16.mxu0 %v209_v22 }
  0x34   :  { %755 = vmatprep.mubr.bf16.mxu1 %v211_v25 }
  0x35   :  { %1016 = vmatpush3.bf16.msra.mxu0 %v1132_v54 }
  0x36   :  { %1017 = vmatprep.subr.bf16.mxu0 %v1134_v56  ;;  %1038 = vmatpush3.bf16.msra.mxu1 %v1133_v55 }
  0x37   :  { %1039 = vmatprep.subr.bf16.mxu1 %v1135_v57 }
  0x39   :  { %1018 = vmatpush3.bf16.msra.mxu0 %v1136_v58 }
  0x3a   :  { %1019 = vmatprep.subr.bf16.mxu0 %v1138_v60  ;;  %1040 = vmatpush3.bf16.msra.mxu1 %v1137_v59 }
  0x3b   :  { %1041 = vmatprep.subr.bf16.mxu1 %v1139_v61 }
  0x3d   :  { %1020 = vmatpush3.bf16.msra.mxu0 %v1140_v62  ;;  %v960_v62 = vld [vmem:[%s1266_s2 + $0x1] ss:$0 sm:$0xff] }
  0x3e   :  { %1021 = vmatprep.subr.bf16.mxu0 %v1142_v0  ;;  %1042 = vmatpush3.bf16.msra.mxu1 %v1141_v63 }
  0x3f   :  { %1043 = vmatprep.subr.bf16.mxu1 %v1143_v1 }
  0x41   :  { %1022 = vmatpush3.bf16.msra.mxu0 %v1144_v2 }
  0x42   :  { %1023 = vmatprep.subr.bf16.mxu0 %v1146_v4  ;;  %1044 = vmatpush3.bf16.msra.mxu1 %v1145_v3 }
  0x43   :  { %1045 = vmatprep.subr.bf16.mxu1 %v1147_v5 }
  0x45   :  { %1024 = vmatpush3.bf16.msra.mxu0 %v1148_v6 }
  0x46   :  { %1025 = vmatprep.subr.bf16.mxu0 %v1150_v8  ;;  %1046 = vmatpush3.bf16.msra.mxu1 %v1149_v7 }
  0x47   :  { %1047 = vmatprep.subr.bf16.mxu1 %v1151_v9 }
  0x49   :  { %1026 = vmatpush3.bf16.msra.mxu0 %v1152_v10 }
  0x4a   :  { %1027 = vmatprep.subr.bf16.mxu0 %v1154_v12  ;;  %1048 = vmatpush3.bf16.msra.mxu1 %v1153_v11 }
  0x4b   :  { %1049 = vmatprep.subr.bf16.mxu1 %v1155_v13 }
  0x4d   :  { %1028 = vmatpush3.bf16.msra.mxu0 %v1156_v14 }
  0x4e   :  { %1050 = vmatpush3.bf16.msra.mxu1 %v1157_v16  ;;  %1066 = vmatprep.subr.bf16.mxu0 %v1217_v27 }
  0x50   :  { %716 = vmatmul.mubr.bf16.vlgmr.msra.gmra.mxu0 %v208_v21 }
  0x51   :  { %756 = vmatmul.mubr.bf16.vlgmr.msra.gmra.mxu1 %v210_v24  ;;  %1067 = vmatpush3.bf16.msra.mxu0 %v1159_v26 }
  0x52   :  { %1068 = vmatprep.subr.bf16.mxu0 %v1217_v27  ;;  %1082 = vmatprep.mubr.msk.bf16.mxu0 %vm1218_vm0, %v1217_v27 }
  0x55   :  { %1069 = vmatpush3.bf16.msra.mxu0 %v1160_v28 }
  0x56   :  { %1070 = vmatprep.subr.bf16.mxu0 %v1217_v27 }
  0x59   :  { %1071 = vmatpush3.bf16.msra.mxu0 %v1161_v29 }
  0x5a   :  { %1072 = vmatprep.subr.bf16.mxu0 %v1217_v27 }
  0x5d   :  { %1073 = vmatpush3.bf16.msra.mxu0 %v1162_v30 }
  0x5e   :  { %1074 = vmatprep.subr.bf16.mxu0 %v1217_v27 }
  0x61   :  { %1075 = vmatpush3.bf16.msra.mxu0 %v1163_v31 }
  0x62   :  { %1076 = vmatprep.subr.bf16.mxu0 %v1217_v27 }
  0x65   :  { %1077 = vmatpush3.bf16.msra.mxu0 %v1164_v32 }
  0x66   :  { %1078 = vmatprep.subr.bf16.mxu0 %v1217_v27 }
  0x69   :  { %1079 = vmatpush3.bf16.msra.mxu0 %v1165_v33 }
  0x6a   :  { %1080 = vmatprep.subr.bf16.mxu0 %v1217_v27 }
  0x6d   :  { %1081 = vmatpush3.bf16.msra.mxu0 %v1166_v34 }
  0xf0   :  { %v985_v35 = vpop.f32.mrf.mxu0 }
  0xf1   :  { %v1007_v36 = vpop.f32.mrf.mxu1 }
  0xf2   :  { %v986_v37 = vpop.f32.mrf.mxu0 }
  0xf3   :  { %v1008_v38 = vpop.f32.mrf.mxu1  ;;  %v987_v43 = vadd.f32 %v986_v37, %v985_v35 }
  0xf4   :  { %v988_v39 = vpop.f32.mrf.mxu0  ;;  %v1009_v46 = vadd.f32 %v1008_v38, %v1007_v36 }
  0xf5   :  { %v1010_v40 = vpop.f32.mrf.mxu1  ;;  %v638_v45 = vadd.f32 %v987_v43, %v894_v44 }
  0xf6   :  { %v989_v41 = vpop.f32.mrf.mxu0 }
  0xf7   :  { %v1011_v42 = vpop.f32.mrf.mxu1  ;;  %v678_v50 = vadd.f32 %v1009_v46, %v638_v45 }
 0x110   :  { %v1029_v47 = vpop.f32.mrf.mxu0 }
 0x111   :  { %v1051_v48 = vpop.f32.mrf.mxu1 }
 0x112   :  { %v1030_v49 = vpop.f32.mrf.mxu0 }
 0x113   :  { %v1031_v51 = vadd.f32 %v1030_v49, %v1029_v47  ;;  %v1052_v52 = vpop.f32.mrf.mxu1 }
 0x114   :  { %v1032_v53 = vpop.f32.mrf.mxu0  ;;  %v1053_v55 = vadd.f32 %v1052_v52, %v1051_v48 }
 0x115   :  { %v718_v54 = vadd.f32 %v1031_v51, %v678_v50  ;;  %v1054_v56 = vpop.f32.mrf.mxu1 }
 0x116   :  { %v1033_v57 = vpop.f32.mrf.mxu0 }
 0x117   :  { %v758_v58 = vadd.f32 %v1053_v55, %v718_v54  ;;  %v1055_v59 = vpop.f32.mrf.mxu1 }
 0x119   :  { %1167 = vtanh.f32 %v758_v58 }
 0x126   :  { %v1168_v60 = vpop.eup %1167 }
 0x127   :  { %v780_v61 = vpack.c.bf16 %v1168_v60, %v1168_v60 }
 0x129   :  { %1083 = vmatmul.mubr.bf16.vlgmr.msra.gmra.mxu0 %v780_v61 }
 0x1e9   :  { %v871_v63 = vpop.f32.mrf.mxu0 }
 0x1ea   :  { %v872_v0 = vadd.f32 %v960_v62, %v871_v63 }
 0x1eb   :  { %v1084_v1 = vpop.f32.mrf.mxu0 }
 0x1ec   :  { %878 = vst.msk [vmem:[#allocation5] sm:$0x3] %vm877_vm1, %v872_v0 }
 0x1ed   :  { %v874_v2 = vpop.f32.mrf.mxu0 }
 0x1ee   :  { %1200 = shalt.err (!%p1197_p9)
}
 0x1ef   :  { %888 = dma.vmem_to_hbm [thread:$0]  %s886_s26, 32, %s1267_s3, [#allocation4]   ;;  %v1085_v3 = vpop.f32.mrf.mxu0 }
 0x1f0   :  { %1211 = dma.done.wait [#allocation4], 32  }
 0x1f1   :  { %1212 = vsyncadd [#allocation4], 4294967264 }
 0x1f2   :  { %892 = vsyncpa [#allocation3], 1 }
 0x1f3   :  { %893 = vsyncpa [#allocation4], 1 }

</bundles_post_ra>
